<compile_context>
chip_gen: v7x
topology: tpu7x:2x2x1
jax: 0.10.0
libtpu: 0.0.40
codegen_flags: <defaults>
</compile_context>

<pallas_src>
import jax
import jax.numpy as jnp
from jax.experimental import pallas as pl
from jax.experimental.pallas import tpu as pltpu


_NEG_SLOPE = 0.01  # nn.LeakyReLU() default negative_slope


def _round_up(n, m):
    return (n + m - 1) // m * m


def _discrim_kernel(x_ref, w1_ref, b1_ref, w2_ref, b2_ref, w3_ref, b3_ref, o_ref):
    # One batch tile of the fused forward pass.
    # Fused f32 -> bf16 cast (VPU; free under MXU work) instead of a wrapper cast.
    x = x_ref[...].astype(jnp.bfloat16)                          # (TB, 784) bf16

    # Linear 1 (784 -> 512): bf16 MXU matmul, f32 accumulate; bias + LeakyReLU in f32.
    h1 = jnp.dot(x, w1_ref[...], preferred_element_type=jnp.float32) + b1_ref[...]
    h1 = jnp.maximum(h1, _NEG_SLOPE * h1)
    h1 = h1.astype(jnp.bfloat16)                                 # back to bf16 for MXU

    # Linear 2 (512 -> 256)
    h2 = jnp.dot(h1, w2_ref[...], preferred_element_type=jnp.float32) + b2_ref[...]
    h2 = jnp.maximum(h2, _NEG_SLOPE * h2)                        # (TB, 256) f32

    # Linear 3 (256 -> 1), computed lane-dense: (8,256) @ (256,TB) -> (8,TB).
    # w3_ref row 0 is the real weight row (rows 1..7 are zero padding); the tiny
    # transposed matmul keeps the logits in lanes so the store is unmasked and
    # avoids TB/8 nearly-empty (TB,1) vregs.
    z8 = jnp.dot(w3_ref[...], h2.T, preferred_element_type=jnp.float32)  # (8, TB)
    z = z8[0:1, :] + b3_ref[...]                                 # (1, TB) f32

    # Sigmoid (numerically stable; exp/logistic goes to the EUP).
    o_ref[0] = jax.nn.sigmoid(z)                                 # o_ref: (1, 1, TB)


def discrim_forward(x_nchw, params, *, batch_tile=None):
    """x_nchw: (B, 1, 28, 28) float32 -> (B, 1) float32 probabilities."""
    w1, b1, w2, b2, w3, b3 = params
    B = x_nchw.shape[0]
    x = x_nchw.reshape(B, 28 * 28)                               # torch .view(-1, 784); stays f32

    # Pick a batch tile: multiple of 8 (sublane).  Default heuristic aims for
    # at least 2 grid tiles when B permits (so v7x's 2 TCs both get work) while
    # capping the tile at 1024 rows to keep the f32 input tiles VMEM-friendly.
    if batch_tile is None:
        tb = max(8, min(1024, _round_up(pl.cdiv(B, 2), 8)))
    else:
        tb = batch_tile
    assert tb % 8 == 0, "batch tile must be a multiple of 8"

    # Pad the batch up to a multiple of the tile (pad rows sliced off below).
    b_pad = _round_up(B, tb)
    if b_pad != B:
        x = jnp.pad(x, ((0, b_pad - B), (0, 0)))

    n_tiles = b_pad // tb
    grid = (n_tiles,)

    # Weights/biases: constant block index => fetched once, VMEM-resident.
    const2d = lambda shape: pl.BlockSpec(shape, lambda i: (0, 0))

    out = pl.pallas_call(
        _discrim_kernel,
        out_shape=jax.ShapeDtypeStruct((n_tiles, 1, tb), jnp.float32),
        grid=grid,
        in_specs=[
            pl.BlockSpec((tb, 28 * 28), lambda i: (i, 0)),       # f32 x batch tile
            const2d(w1.shape), const2d(b1.shape),
            const2d(w2.shape), const2d(b2.shape),
            const2d(w3.shape), const2d(b3.shape),
        ],
        out_specs=pl.BlockSpec((1, 1, tb), lambda i: (i, 0, 0)), # lane-dense output row
        compiler_params=pltpu.CompilerParams(
            dimension_semantics=("parallel",),                   # shard tiles across v7x TCs
            vmem_limit_bytes=32 * 1024 * 1024,                   # f32 tiles > v5e's 16 MiB default
        ),
    )(x, w1, b1, w2, b2, w3, b3)

    return out.reshape(b_pad, 1)[:B]


def init_params(key):
    """Deterministic init matching nn.Linear fan-in bounds.

    w1/w2 stored (in, out) in bf16 for the MXU; biases stay f32.  w3 is stored
    as an (8, 256) f32 block whose row 0 equals torch's Linear(256,1).weight
    (rows 1..7 are zeros, only there to keep the MXU M-dim sublane-aligned).
    """
    k1, k2, k3, k4, k5, k6 = jax.random.split(key, 6)

    def uniform(k, shape, fan_in, dtype):
        bound = 1.0 / jnp.sqrt(fan_in)
        return jax.random.uniform(k, shape, jnp.float32, -bound, bound).astype(dtype)

    w1 = uniform(k1, (784, 512), 784.0, jnp.bfloat16)
    b1 = uniform(k2, (1, 512), 784.0, jnp.float32)
    w2 = uniform(k3, (512, 256), 512.0, jnp.bfloat16)
    b2 = uniform(k4, (1, 256), 512.0, jnp.float32)
    w3_row = uniform(k5, (1, 256), 256.0, jnp.float32)
    w3 = jnp.zeros((8, 256), jnp.float32).at[0:1, :].set(w3_row)
    b3 = uniform(k6, (1, 1), 256.0, jnp.float32)
    return (w1, b1, w2, b2, w3, b3)


def _reference(x_nchw, params):
    """Pure-JAX reference mirroring the kernel's numerics (bf16 matmul inputs,
    f32 accumulation, f32 epilogue)."""
    w1, b1, w2, b2, w3, b3 = params
    x = x_nchw.reshape(x_nchw.shape[0], 784).astype(jnp.bfloat16)
    h1 = jnp.dot(x, w1, preferred_element_type=jnp.float32) + b1
    h1 = jnp.maximum(h1, _NEG_SLOPE * h1)
    h2 = jnp.dot(h1.astype(jnp.bfloat16), w2, preferred_element_type=jnp.float32) + b2
    h2 = jnp.maximum(h2, _NEG_SLOPE * h2)
    w3_row = w3[0:1, :]                                          # real (1, 256) weight row
    z = jnp.dot(h2, w3_row.T, preferred_element_type=jnp.float32) + b3
    return jax.nn.sigmoid(z)


if __name__ == "__main__":
    key = jax.random.PRNGKey(0)
    kx, kp = jax.random.split(key)
    params = init_params(kp)

    # Small demo batch (single tile, tb=8).
    B = 8
    x = jax.random.normal(kx, (B, 1, 28, 28), jnp.float32)       # NCHW like torch
    y = discrim_forward(x, params)
    jax.block_until_ready(y)
    y_ref = _reference(x, params)
    assert y.shape == (B, 1)
    assert bool(jnp.all(jnp.isfinite(y)))
    assert jnp.allclose(y, y_ref, atol=1e-3, rtol=1e-3)

    # Ragged batch with the default heuristic: tb=152, pads 300 -> 304, grid=(2,)
    # (exercises padding, multi-tile grid, weight residency, megacore split).
    B2 = 300
    x2 = jax.random.normal(kx, (B2, 1, 28, 28), jnp.float32)
    y2 = discrim_forward(x2, params)
    jax.block_until_ready(y2)
    y2_ref = _reference(x2, params)
    assert y2.shape == (B2, 1)
    assert jnp.allclose(y2, y2_ref, atol=1e-3, rtol=1e-3)

    # Explicit tile override path (pads 300 -> 384, grid=(3,)).
    y3 = discrim_forward(x2, params, batch_tile=128)
    jax.block_until_ready(y3)
    assert y3.shape == (B2, 1)
    assert jnp.allclose(y3, y2_ref, atol=1e-3, rtol=1e-3)

    print("KERNEL_OK")
</pallas_src>

<mosaic_0001>
module attributes {stable_mosaic.version = 11 : i64} {
  func.func @_discrim_kernel(%arg0: i32, %arg1: memref<8x784xf32, #tpu.memory_space<vmem>>, %arg2: memref<784x512xbf16, #tpu.memory_space<vmem>>, %arg3: memref<1x512xf32, #tpu.memory_space<vmem>>, %arg4: memref<512x256xbf16, #tpu.memory_space<vmem>>, %arg5: memref<1x256xf32, #tpu.memory_space<vmem>>, %arg6: memref<8x256xf32, #tpu.memory_space<vmem>>, %arg7: memref<1x1xf32, #tpu.memory_space<vmem>>, %arg8: memref<1x1x8xf32, #tpu.memory_space<vmem>>) attributes {dimension_semantics = [#tpu.dimension_semantics<parallel>], iteration_bounds = array<i64: 1>, scalar_prefetch = 0 : i64, scratch_operands = 0 : i64, tpu.core_type = #tpu.core_type<tc>, window_params = [{transform_indices = @transform_0, window_bounds = array<i64: 8, 784>}, {pipeline_mode = #tpu.pipeline_mode<synchronous>, transform_indices = @transform_1, window_bounds = array<i64: 784, 512>}, {pipeline_mode = #tpu.pipeline_mode<synchronous>, transform_indices = @transform_2, window_bounds = array<i64: 1, 512>}, {pipeline_mode = #tpu.pipeline_mode<synchronous>, transform_indices = @transform_3, window_bounds = array<i64: 512, 256>}, {pipeline_mode = #tpu.pipeline_mode<synchronous>, transform_indices = @transform_4, window_bounds = array<i64: 1, 256>}, {pipeline_mode = #tpu.pipeline_mode<synchronous>, transform_indices = @transform_5, window_bounds = array<i64: 8, 256>}, {pipeline_mode = #tpu.pipeline_mode<synchronous>, transform_indices = @transform_6, window_bounds = array<i64: 1, 1>}, {transform_indices = @transform_7, window_bounds = array<i64: 1, 1, 8>}]} {
    %c0 = arith.constant 0 : index
    %c0_0 = arith.constant 0 : index
    %0 = vector.load %arg1[%c0, %c0_0] : memref<8x784xf32, #tpu.memory_space<vmem>>, vector<8x784xf32>
    %1 = arith.truncf %0 : vector<8x784xf32> to vector<8x784xbf16>
    %c0_1 = arith.constant 0 : index
    %c0_2 = arith.constant 0 : index
    %2 = vector.load %arg2[%c0_1, %c0_2] : memref<784x512xbf16, #tpu.memory_space<vmem>>, vector<784x512xbf16>
    %cst = arith.constant dense<0.000000e+00> : vector<8x512xf32>
    %3 = tpu.matmul %1, %2, %cst {dimension_numbers = #tpu.dot_dimension_numbers<[1], [0], [0], [1], [0, 0, 1, 1], [], []>} : vector<8x784xbf16>, vector<784x512xbf16>, vector<8x512xf32> -> vector<8x512xf32>
    %c0_3 = arith.constant 0 : index
    %c0_4 = arith.constant 0 : index
    %4 = vector.load %arg3[%c0_3, %c0_4] : memref<1x512xf32, #tpu.memory_space<vmem>>, vector<1x512xf32>
    %5 = vector.broadcast %4 : vector<1x512xf32> to vector<8x512xf32>
    %6 = arith.addf %3, %5 : vector<8x512xf32>
    %cst_5 = arith.constant 0.00999999977 : f32
    %7 = vector.broadcast %cst_5 : f32 to vector<8x512xf32>
    %8 = arith.mulf %7, %6 : vector<8x512xf32>
    %9 = arith.maximumf %6, %8 : vector<8x512xf32>
    %10 = arith.truncf %9 : vector<8x512xf32> to vector<8x512xbf16>
    %c0_6 = arith.constant 0 : index
    %c0_7 = arith.constant 0 : index
    %11 = vector.load %arg4[%c0_6, %c0_7] : memref<512x256xbf16, #tpu.memory_space<vmem>>, vector<512x256xbf16>
    %cst_8 = arith.constant dense<0.000000e+00> : vector<8x256xf32>
    %12 = tpu.matmul %10, %11, %cst_8 {dimension_numbers = #tpu.dot_dimension_numbers<[1], [0], [0], [1], [0, 0, 1, 1], [], []>} : vector<8x512xbf16>, vector<512x256xbf16>, vector<8x256xf32> -> vector<8x256xf32>
    %c0_9 = arith.constant 0 : index
    %c0_10 = arith.constant 0 : index
    %13 = vector.load %arg5[%c0_9, %c0_10] : memref<1x256xf32, #tpu.memory_space<vmem>>, vector<1x256xf32>
    %14 = vector.broadcast %13 : vector<1x256xf32> to vector<8x256xf32>
    %15 = arith.addf %12, %14 : vector<8x256xf32>
    %cst_11 = arith.constant 0.00999999977 : f32
    %16 = vector.broadcast %cst_11 : f32 to vector<8x256xf32>
    %17 = arith.mulf %16, %15 : vector<8x256xf32>
    %18 = arith.maximumf %15, %17 : vector<8x256xf32>
    %c0_12 = arith.constant 0 : index
    %c0_13 = arith.constant 0 : index
    %19 = vector.load %arg6[%c0_12, %c0_13] : memref<8x256xf32, #tpu.memory_space<vmem>>, vector<8x256xf32>
    %20 = tpu.transpose %18, [1, 0] : vector<8x256xf32> -> vector<256x8xf32>
    %cst_14 = arith.constant dense<0.000000e+00> : vector<8x8xf32>
    %21 = tpu.matmul %19, %20, %cst_14 {dimension_numbers = #tpu.dot_dimension_numbers<[1], [0], [0], [1], [0, 0, 1, 1], [], []>} : vector<8x256xf32>, vector<256x8xf32>, vector<8x8xf32> -> vector<8x8xf32>
    %22 = vector.extract_strided_slice %21 {offsets = [0, 0], sizes = [1, 8], strides = [1, 1]} : vector<8x8xf32> to vector<1x8xf32>
    %c0_15 = arith.constant 0 : index
    %c0_16 = arith.constant 0 : index
    %23 = vector.load %arg7[%c0_15, %c0_16] : memref<1x1xf32, #tpu.memory_space<vmem>>, vector<1x1xf32>
    %24 = vector.broadcast %23 : vector<1x1xf32> to vector<1x8xf32>
    %25 = arith.addf %22, %24 : vector<1x8xf32>
    %26 = arith.negf %25 : vector<1x8xf32>
    %27 = math.exp %26 : vector<1x8xf32>
    %cst_17 = arith.constant 1.000000e+00 : f32
    %28 = vector.broadcast %cst_17 : f32 to vector<1x8xf32>
    %29 = arith.addf %28, %27 : vector<1x8xf32>
    %30 = arith.divf %28, %29 : vector<1x8xf32>
    %c0_18 = arith.constant 0 : index
    %c0_19 = arith.constant 0 : index
    %c0_20 = arith.constant 0 : index
    %31 = vector.load %arg8[%c0_18, %c0_19, %c0_20] : memref<1x1x8xf32, #tpu.memory_space<vmem>>, vector<1x1x8xf32>
    %32 = vector.shape_cast %31 : vector<1x1x8xf32> to vector<1x8xf32>
    %33 = vector.shape_cast %30 : vector<1x8xf32> to vector<1x1x8xf32>
    tpu.vector_store %arg8[%c0_18, %c0_19, %c0_20], %33 {strides = array<i32>} : memref<1x1x8xf32, #tpu.memory_space<vmem>>, vector<1x1x8xf32>,
    return
  }
  func.func @transform_0(%arg0: i32) -> (i32, i32) {
    %c0_i32 = arith.constant 0 : i32
    %c0_i32_0 = arith.constant 0 : i32
    return %arg0, %c0_i32 : i32, i32
  }
  func.func @transform_1(%arg0: i32) -> (i32, i32) {
    %c0_i32 = arith.constant 0 : i32
    %c0_i32_0 = arith.constant 0 : i32
    %c0_i32_1 = arith.constant 0 : i32
    return %c0_i32, %c0_i32_0 : i32, i32
  }
  func.func @transform_2(%arg0: i32) -> (i32, i32) {
    %c0_i32 = arith.constant 0 : i32
    %c0_i32_0 = arith.constant 0 : i32
    %c0_i32_1 = arith.constant 0 : i32
    return %c0_i32, %c0_i32_0 : i32, i32
  }
  func.func @transform_3(%arg0: i32) -> (i32, i32) {
    %c0_i32 = arith.constant 0 : i32
    %c0_i32_0 = arith.constant 0 : i32
    %c0_i32_1 = arith.constant 0 : i32
    return %c0_i32, %c0_i32_0 : i32, i32
  }
  func.func @transform_4(%arg0: i32) -> (i32, i32) {
    %c0_i32 = arith.constant 0 : i32
    %c0_i32_0 = arith.constant 0 : i32
    %c0_i32_1 = arith.constant 0 : i32
    return %c0_i32, %c0_i32_0 : i32, i32
  }
  func.func @transform_5(%arg0: i32) -> (i32, i32) {
    %c0_i32 = arith.constant 0 : i32
    %c0_i32_0 = arith.constant 0 : i32
    %c0_i32_1 = arith.constant 0 : i32
    return %c0_i32, %c0_i32_0 : i32, i32
  }
  func.func @transform_6(%arg0: i32) -> (i32, i32) {
    %c0_i32 = arith.constant 0 : i32
    %c0_i32_0 = arith.constant 0 : i32
    %c0_i32_1 = arith.constant 0 : i32
    return %c0_i32, %c0_i32_0 : i32, i32
  }
  func.func @transform_7(%arg0: i32) -> (i32, i32, i32) {
    %c0_i32 = arith.constant 0 : i32
    %c0_i32_0 = arith.constant 0 : i32
    %c0_i32_1 = arith.constant 0 : i32
    return %arg0, %c0_i32, %c0_i32_0 : i32, i32, i32
  }
}

</mosaic_0001>

<bundles_post_ra>
// kernel: tpu_custom_call.1
= control target key start
LH: loop header
LB: loop body
LE: loop exit
PB: predicated region body
PF: predicated region fallthrough
CT: control target
= control target key end

     0   :  { %s3173_s0 = inlined_call_operand.hbm [shape: f32[8,784], index: 0, kind: input, shape index: {}]   ;;  %s3174_s1 = inlined_call_operand.hbm [shape: bf16[784,512], index: 1, kind: input, shape index: {}]   ;;  %s3175_s2 = inlined_call_operand.vmem [shape: f32[1,512], index: 2, kind: input, shape index: {}]   ;;  %s3176_s3 = inlined_call_operand.hbm [shape: bf16[512,256], index: 3, kind: input, shape index: {}]   ;;  %s3177_s4 = inlined_call_operand.vmem [shape: f32[1,256], index: 4, kind: input, shape index: {}]   ;;  %s3178_s5 = inlined_call_operand.vmem [shape: f32[8,256], index: 5, kind: input, shape index: {}]   ;;  %s3179_s6 = inlined_call_operand.<no memory space> [shape: f32[1,1], index: 6, kind: input, shape index: {}]   ;;  %s3180_s7 = inlined_call_operand.hbm [shape: f32[1,1,8], index: 7, kind: output, shape index: {}]  }
   0x1   :  { %v12_v0 = vstv %s3179_s6 }
   0x2   :  { %13 = vst [vmem:[#allocation2] sm:$0x1] %v12_v0 }
   0x3   :  { %14 = vsyncpa [#allocation4], 0 }
   0x4   :  { %15 = vsyncpa [#allocation7], 0 }
   0x5   :  { %16 = vsyncpa [#allocation5], 0  ;;  %s3007_s26 = smov [#allocation6]   ;;  %s2913_s30 = scalar_lea.hbm %s3174_s1, 25088 }
   0x6   :  { %s32_s27 = sshll.u32 %s3007_s26, 4  ;;  %p2914_p0 = scmp.ne.s32.totalorder %s3174_s1, %s2913_s30  ;;  %s33_s27 = int_to_ptr.vmem [resolvable:$true] %s32_s27 }
   0x7   :  { %p2917_p1 = scmp.lt.u32.totalorder %s2913_s30, %s3174_s1 }
   0x9   :  { %p2919_p2 = pnand %p2917_p1, %p2914_p0 }
   0xb   :  { %2922 = shalt.err (!%p2919_p2)
}
   0xc   :  { %s2923_s6 = scalar_lea.vmem %s33_s27, 25088  ;;  %p2928_p4 = scmp.lt.s32.totalorder %s33_s27, %s33_s27 }
   0xd   :  { %p2924_p3 = scmp.ne.s32.totalorder %s33_s27, %s2923_s6  ;;  %p2929_p5 = scmp.lt.s32.totalorder %s2923_s6, %s2923_s6 }
   0xf   :  { %p2930_p6 = por %p2929_p5, %p2928_p4 }
  0x11   :  { %p2931_p7 = pnand %p2930_p6, %p2924_p3 }
  0x13   :  { %2934 = shalt.err (!%p2931_p7)
}
  0x14   :  { %s3008_s12 = smov 256   ;;  %s3009_s13 = smov 16  }
  0x15   :  { %38 = dma.hbm_to_vmem [thread:$0]  %s3174_s1, 25088, %s33_s27, [#allocation7], %s3008_s12, %s3008_s12, %s3009_s13  }
  0x16   :  { %s3010_s16 = smov [#allocation3]   ;;  %s3011_s18 = smov [#allocation8]  }
  0x17   :  { %s23_s17 = sshll.u32 %s3010_s16, 4  ;;  %s46_s19 = sshll.u32 %s3011_s18, 4  ;;  %s24_s17 = int_to_ptr.vmem [resolvable:$true] %s23_s17  ;;  %s47_s19 = int_to_ptr.vmem [resolvable:$true] %s46_s19 }
  0x18   :  { %s2935_s22 = scalar_lea.hbm %s3173_s0, 896 }
  0x19   :  { %p2936_p8 = scmp.ne.s32.totalorder %s3173_s0, %s2935_s22  ;;  %p2939_p9 = scmp.lt.u32.totalorder %s2935_s22, %s3173_s0 }
  0x1b   :  { %p2941_p10 = pnand %p2939_p9, %p2936_p8 }
  0x1d   :  { %2944 = shalt.err (!%p2941_p10)
}
  0x1e   :  { %s2945_s1 = scalar_lea.vmem %s24_s17, 896  ;;  %p2950_p12 = scmp.lt.s32.totalorder %s24_s17, %s24_s17 }
  0x1f   :  { %p2946_p11 = scmp.ne.s32.totalorder %s24_s17, %s2945_s1  ;;  %p2951_p13 = scmp.lt.s32.totalorder %s2945_s1, %s2945_s1 }
  0x21   :  { %p2952_p0 = por %p2951_p13, %p2950_p12 }
  0x23   :  { %p2953_p1 = pnand %p2952_p0, %p2946_p11 }
  0x25   :  { %2956 = shalt.err (!%p2953_p1)
}
  0x26   :  { %26 = dma.hbm_to_vmem [thread:$0]  %s3173_s0, 896, %s24_s17, [#allocation4]  }
  0x27   :  { %s2957_s8 = scalar_lea.hbm %s3176_s3, 8192 }
  0x28   :  { %p2958_p2 = scmp.ne.s32.totalorder %s3176_s3, %s2957_s8  ;;  %p2961_p3 = scmp.lt.u32.totalorder %s2957_s8, %s3176_s3 }
  0x2a   :  { %p2963_p4 = pnand %p2961_p3, %p2958_p2 }
  0x2c   :  { %2966 = shalt.err (!%p2963_p4)
}
  0x2d   :  { %s2967_s12 = scalar_lea.vmem %s47_s19, 8192  ;;  %p2972_p6 = scmp.lt.s32.totalorder %s47_s19, %s47_s19 }
  0x2e   :  { %p2968_p5 = scmp.ne.s32.totalorder %s47_s19, %s2967_s12  ;;  %p2973_p7 = scmp.lt.s32.totalorder %s2967_s12, %s2967_s12 }
  0x30   :  { %p2974_p8 = por %p2973_p7, %p2972_p6 }
  0x32   :  { %p2975_p9 = pnand %p2974_p8, %p2968_p5 }
  0x34   :  { %2978 = shalt.err (!%p2975_p9)
}
  0x35   :  { %s3012_s0 = smov 128   ;;  %s3013_s13 = smov 8  }
  0x36   :  { %52 = dma.hbm_to_vmem [thread:$0]  %s3176_s3, 8192, %s47_s19, [#allocation7], %s3012_s0, %s3012_s0, %s3013_s13  }
  0x37   :  { %3001 = dma.done.wait [#allocation4], 896  }
  0x38   :  { %3002 = vsyncadd [#allocation4], 4294966400 }
  0x39   :  { %3003 = dma.done.wait [#allocation7], 33280  }
  0x3a   :  { %3004 = vsyncadd [#allocation7], 4294934016  ;;  %v2519_v1 = vld [vmem:[#allocation6 + $0x4] ss:$16 sps:$4 sm:$0xff]   ;;  %v2523_v3 = vld [vmem:[#allocation6] ss:$16 sps:$4 sm:$0xff]  }
  0x3b   :  { %v2521_v2 = vld [vmem:[#allocation6 + $0x204] ss:$16 sps:$4 sm:$0xff]   ;;  %1285 = vmatprep.subr.bf16.mxu1 %v2519_v1  ;;  %v2524_v4 = vld [vmem:[#allocation6 + $0x200] ss:$16 sps:$4 sm:$0xff]   ;;  %v3014_v19 = vmov 0   ;;  %vm1281_vm0 = vcmask 130048  }
  0x3c   :  { %1326 = vmatprep.subr.bf16.mxu0 %v2521_v2  ;;  %v2525_v5 = vld [vmem:[#allocation6 + $0x24] ss:$16 sps:$4 sm:$0xff]   ;;  %1286 = vmatpush1.bf16.msra.mxu1 %v2523_v3  ;;  %v2529_v7 = vld [vmem:[#allocation6 + $0x20] ss:$16 sps:$4 sm:$0xff]   ;;  %vm2196_vm1 = vcmask 57344  }
  0x3d   :  { %1327 = vmatpush1.bf16.msra.mxu0 %v2524_v4  ;;  %v2527_v6 = vld [vmem:[#allocation6 + $0x224] ss:$16 sps:$4 sm:$0xff]   ;;  %1287 = vmatprep.subr.bf16.mxu1 %v2525_v5  ;;  %v2530_v8 = vld [vmem:[#allocation6 + $0x220] ss:$16 sps:$4 sm:$0xff]  }
  0x3e   :  { %1328 = vmatprep.subr.bf16.mxu0 %v2527_v6  ;;  %v2531_v9 = vld [vmem:[#allocation6 + $0x44] ss:$16 sps:$4 sm:$0xff]   ;;  %v2535_v11 = vld [vmem:[#allocation6 + $0x40] ss:$16 sps:$4 sm:$0xff]   ;;  %2518 = vset.pattern.permute.xlu0 %v3014_v19  ;;  %v69_v6 = vld [vmem:[#allocation3] sm:$0xff] }
  0x3f   :  { %v2533_v10 = vld [vmem:[#allocation6 + $0x244] ss:$16 sps:$4 sm:$0xff]   ;;  %v2536_v12 = vld [vmem:[#allocation6 + $0x240] ss:$16 sps:$4 sm:$0xff]  }
  0x40   :  { %1288 = vmatpush1.bf16.msra.mxu1 %v2529_v7  ;;  %v2537_v13 = vld [vmem:[#allocation6 + $0x64] ss:$16 sps:$4 sm:$0xff]   ;;  %v2541_v15 = vld [vmem:[#allocation6 + $0x60] ss:$16 sps:$4 sm:$0xff]  }
  0x41   :  { %1329 = vmatpush1.bf16.msra.mxu0 %v2530_v8  ;;  %1289 = vmatprep.subr.bf16.mxu1 %v2531_v9  ;;  %v2539_v14 = vld [vmem:[#allocation6 + $0x264] ss:$16 sps:$4 sm:$0xff]   ;;  %v2542_v16 = vld [vmem:[#allocation6 + $0x260] ss:$16 sps:$4 sm:$0xff]   ;;  %v71_v8 = vld [vmem:[#allocation3 + $0x10] sm:$0xff] }
  0x42   :  { %1330 = vmatprep.subr.bf16.mxu0 %v2533_v10  ;;  %v2543_v17 = vld [vmem:[#allocation6 + $0x84] ss:$16 sps:$4 sm:$0xff]   ;;  %v2547_v20 = vld [vmem:[#allocation6 + $0x80] ss:$16 sps:$4 sm:$0xff]   ;;  %v2620_v9 = vld [vmem:[#allocation6 + $0xc] ss:$16 sps:$4 sm:$0xff]   ;;  %v3102_v10 = vpack.c.bf16 %v69_v6, %v69_v6 }
  0x43   :  { %v2545_v18 = vld [vmem:[#allocation6 + $0x284] ss:$16 sps:$4 sm:$0xff]   ;;  %v2548_v21 = vld [vmem:[#allocation6 + $0x280] ss:$16 sps:$4 sm:$0xff]  }
  0x44   :  { %1290 = vmatpush1.bf16.msra.mxu1 %v2535_v11  ;;  %v2549_v22 = vld [vmem:[#allocation6 + $0xa4] ss:$16 sps:$4 sm:$0xff]   ;;  %v2553_v24 = vld [vmem:[#allocation6 + $0xa0] ss:$16 sps:$4 sm:$0xff]  }
  0x45   :  { %1331 = vmatpush1.bf16.msra.mxu0 %v2536_v12  ;;  %1291 = vmatprep.subr.bf16.mxu1 %v2537_v13  ;;  %v2551_v23 = vld [vmem:[#allocation6 + $0x2a4] ss:$16 sps:$4 sm:$0xff]   ;;  %v2554_v25 = vld [vmem:[#allocation6 + $0x2a0] ss:$16 sps:$4 sm:$0xff]   ;;  %v2618_v12 = vld [vmem:[#allocation6 + $0x8] ss:$16 sps:$4 sm:$0xff]   ;;  %v3104_v13 = vpack.c.bf16 %v71_v8, %v71_v8 }
  0x46   :  { %1332 = vmatprep.subr.bf16.mxu0 %v2539_v14  ;;  %v2555_v26 = vld [vmem:[#allocation6 + $0xc4] ss:$16 sps:$4 sm:$0xff]   ;;  %v2559_v28 = vld [vmem:[#allocation6 + $0xc0] ss:$16 sps:$4 sm:$0xff]  }
  0x47   :  { %v2557_v27 = vld [vmem:[#allocation6 + $0x2c4] ss:$16 sps:$4 sm:$0xff]   ;;  %v2560_v29 = vld [vmem:[#allocation6 + $0x2c0] ss:$16 sps:$4 sm:$0xff]  }
  0x48   :  { %1292 = vmatpush1.bf16.msra.mxu1 %v2541_v15  ;;  %v2561_v30 = vld [vmem:[#allocation6 + $0xe4] ss:$16 sps:$4 sm:$0xff]   ;;  %v2565_v32 = vld [vmem:[#allocation6 + $0xe0] ss:$16 sps:$4 sm:$0xff]   ;;  %v2626_v15 = vld [vmem:[#allocation6 + $0x2c] ss:$16 sps:$4 sm:$0xff]  }
  0x49   :  { %1333 = vmatpush1.bf16.msra.mxu0 %v2542_v16  ;;  %1293 = vmatprep.subr.bf16.mxu1 %v2543_v17  ;;  %v2563_v31 = vld [vmem:[#allocation6 + $0x2e4] ss:$16 sps:$4 sm:$0xff]   ;;  %v2566_v33 = vld [vmem:[#allocation6 + $0x2e0] ss:$16 sps:$4 sm:$0xff]   ;;  %v2624_v17 = vld [vmem:[#allocation6 + $0x28] ss:$16 sps:$4 sm:$0xff]  }
  0x4a   :  { %1334 = vmatprep.subr.bf16.mxu0 %v2545_v18  ;;  %v2567_v34 = vld [vmem:[#allocation6 + $0x104] ss:$16 sps:$4 sm:$0xff]   ;;  %v2571_v36 = vld [vmem:[#allocation6 + $0x100] ss:$16 sps:$4 sm:$0xff]  }
  0x4b   :  { %v2569_v35 = vld [vmem:[#allocation6 + $0x304] ss:$16 sps:$4 sm:$0xff]   ;;  %v2572_v37 = vld [vmem:[#allocation6 + $0x300] ss:$16 sps:$4 sm:$0xff]  }
  0x4c   :  { %1294 = vmatpush1.bf16.msra.mxu1 %v2547_v20  ;;  %v2573_v38 = vld [vmem:[#allocation6 + $0x124] ss:$16 sps:$4 sm:$0xff]   ;;  %v2577_v40 = vld [vmem:[#allocation6 + $0x120] ss:$16 sps:$4 sm:$0xff]   ;;  %v2632_v20 = vld [vmem:[#allocation6 + $0x4c] ss:$16 sps:$4 sm:$0xff]  }
  0x4d   :  { %1335 = vmatpush1.bf16.msra.mxu0 %v2548_v21  ;;  %1295 = vmatprep.subr.bf16.mxu1 %v2549_v22  ;;  %v2575_v39 = vld [vmem:[#allocation6 + $0x324] ss:$16 sps:$4 sm:$0xff]   ;;  %v2578_v41 = vld [vmem:[#allocation6 + $0x320] ss:$16 sps:$4 sm:$0xff]   ;;  %v2630_v22 = vld [vmem:[#allocation6 + $0x48] ss:$16 sps:$4 sm:$0xff]  }
  0x4e   :  { %1336 = vmatprep.subr.bf16.mxu0 %v2551_v23  ;;  %v2579_v42 = vld [vmem:[#allocation6 + $0x144] ss:$16 sps:$4 sm:$0xff]   ;;  %v2583_v44 = vld [vmem:[#allocation6 + $0x140] ss:$16 sps:$4 sm:$0xff]  }
  0x4f   :  { %v2581_v43 = vld [vmem:[#allocation6 + $0x344] ss:$16 sps:$4 sm:$0xff]   ;;  %v2584_v45 = vld [vmem:[#allocation6 + $0x340] ss:$16 sps:$4 sm:$0xff]  }
  0x50   :  { %1296 = vmatpush1.bf16.msra.mxu1 %v2553_v24  ;;  %v2585_v46 = vld [vmem:[#allocation6 + $0x164] ss:$16 sps:$4 sm:$0xff]   ;;  %v2589_v49 = vld [vmem:[#allocation6 + $0x160] ss:$16 sps:$4 sm:$0xff]   ;;  %v2638_v24 = vld [vmem:[#allocation6 + $0x6c] ss:$16 sps:$4 sm:$0xff]  }
  0x51   :  { %1337 = vmatpush1.bf16.msra.mxu0 %v2554_v25  ;;  %1297 = vmatprep.subr.bf16.mxu1 %v2555_v26  ;;  %v2587_v47 = vld [vmem:[#allocation6 + $0x364] ss:$16 sps:$4 sm:$0xff]   ;;  %v2590_v52 = vld [vmem:[#allocation6 + $0x360] ss:$16 sps:$4 sm:$0xff]   ;;  %v2636_v26 = vld [vmem:[#allocation6 + $0x68] ss:$16 sps:$4 sm:$0xff]  }
  0x52   :  { %1338 = vmatprep.subr.bf16.mxu0 %v2557_v27  ;;  %v70_v48 = vld [vmem:[#allocation3 + $0x8] sm:$0xff]  ;;  %v72_v51 = vld [vmem:[#allocation3 + $0x18] sm:$0xff] }
  0x53   :  { %v3096_v50 = vpack.c.bf16 %v70_v48, %v70_v48  ;;  %v2591_v53 = vld [vmem:[#allocation6 + $0x184] ss:$16 sps:$4 sm:$0xff]   ;;  %v3098_v54 = vpack.c.bf16 %v72_v51, %v72_v51  ;;  %v2595_v56 = vld [vmem:[#allocation6 + $0x180] ss:$16 sps:$4 sm:$0xff]   ;;  %v2666_v48 = vld [vmem:[#allocation6 + $0x108] ss:$16 sps:$4 sm:$0xff]  }
  0x54   :  { %1298 = vmatpush1.bf16.msra.mxu1 %v2559_v28  ;;  %v2593_v55 = vld [vmem:[#allocation6 + $0x384] ss:$16 sps:$4 sm:$0xff]   ;;  %v2596_v57 = vld [vmem:[#allocation6 + $0x380] ss:$16 sps:$4 sm:$0xff]   ;;  %v2644_v28 = vld [vmem:[#allocation6 + $0x8c] ss:$16 sps:$4 sm:$0xff]  }
  0x55   :  { %1339 = vmatpush1.bf16.msra.mxu0 %v2560_v29  ;;  %1299 = vmatprep.subr.bf16.mxu1 %v2561_v30  ;;  %v2597_v58 = vld [vmem:[#allocation6 + $0x1a4] ss:$16 sps:$4 sm:$0xff]   ;;  %v2601_v60 = vld [vmem:[#allocation6 + $0x1a0] ss:$16 sps:$4 sm:$0xff]   ;;  %v2642_v30 = vld [vmem:[#allocation6 + $0x88] ss:$16 sps:$4 sm:$0xff]  }
  0x56   :  { %1340 = vmatprep.subr.bf16.mxu0 %v2563_v31  ;;  %1317 = vmatprep.mubr.bf16.mxu1 %v3096_v50  ;;  %v2599_v59 = vld [vmem:[#allocation6 + $0x3a4] ss:$16 sps:$4 sm:$0xff]   ;;  %v2602_v61 = vld [vmem:[#allocation6 + $0x3a0] ss:$16 sps:$4 sm:$0xff]  }
  0x57   :  { %1358 = vmatprep.mubr.bf16.mxu0 %v3098_v54  ;;  %v2603_v62 = vld [vmem:[#allocation6 + $0x1c4] ss:$16 sps:$4 sm:$0xff]   ;;  %v2607_v0 = vld [vmem:[#allocation6 + $0x1c0] ss:$16 sps:$4 sm:$0xff]  }
  0x58   :  { %1300 = vmatpush1.bf16.msra.mxu1 %v2565_v32  ;;  %v2605_v63 = vld [vmem:[#allocation6 + $0x3c4] ss:$16 sps:$4 sm:$0xff]   ;;  %v2608_v1 = vld [vmem:[#allocation6 + $0x3c0] ss:$16 sps:$4 sm:$0xff]   ;;  %v2650_v32 = vld [vmem:[#allocation6 + $0xac] ss:$16 sps:$4 sm:$0xff]  }
  0x59   :  { %1341 = vmatpush1.bf16.msra.mxu0 %v2566_v33  ;;  %1301 = vmatprep.subr.bf16.mxu1 %v2567_v34  ;;  %v2609_v2 = vld [vmem:[#allocation6 + $0x1e4] ss:$16 sps:$4 sm:$0xff]   ;;  %v2613_v4 = vld [vmem:[#allocation6 + $0x1e0] ss:$16 sps:$4 sm:$0xff]   ;;  %v2648_v34 = vld [vmem:[#allocation6 + $0xa8] ss:$16 sps:$4 sm:$0xff]  }
  0x5a   :  { %1342 = vmatprep.subr.bf16.mxu0 %v2569_v35  ;;  %v2611_v3 = vld [vmem:[#allocation6 + $0x3e4] ss:$16 sps:$4 sm:$0xff]   ;;  %v2614_v5 = vld [vmem:[#allocation6 + $0x3e0] ss:$16 sps:$4 sm:$0xff]  }
  0x5b   :  { %v2617_v7 = vld [vmem:[#allocation6 + $0x404] ss:$16 sps:$4 sm:$0xff]   ;;  %v2615_v11 = vld [vmem:[#allocation6 + $0x400] ss:$16 sps:$4 sm:$0xff]  }
  0x5c   :  { %1302 = vmatpush1.bf16.msra.mxu1 %v2571_v36  ;;  %v2623_v14 = vld [vmem:[#allocation6 + $0x424] ss:$16 sps:$4 sm:$0xff]   ;;  %v2621_v16 = vld [vmem:[#allocation6 + $0x420] ss:$16 sps:$4 sm:$0xff]   ;;  %v2656_v36 = vld [vmem:[#allocation6 + $0xcc] ss:$16 sps:$4 sm:$0xff]  }
  0x5d   :  { %1343 = vmatpush1.bf16.msra.mxu0 %v2572_v37  ;;  %1303 = vmatprep.subr.bf16.mxu1 %v2573_v38  ;;  %v2629_v18 = vld [vmem:[#allocation6 + $0x444] ss:$16 sps:$4 sm:$0xff]   ;;  %v2627_v21 = vld [vmem:[#allocation6 + $0x440] ss:$16 sps:$4 sm:$0xff]  }
  0x5e   :  { %1344 = vmatprep.subr.bf16.mxu0 %v2575_v39  ;;  %v2635_v23 = vld [vmem:[#allocation6 + $0x464] ss:$16 sps:$4 sm:$0xff]   ;;  %v2633_v25 = vld [vmem:[#allocation6 + $0x460] ss:$16 sps:$4 sm:$0xff]  }
  0x5f   :  { %v2641_v27 = vld [vmem:[#allocation6 + $0x484] ss:$16 sps:$4 sm:$0xff]   ;;  %v2639_v29 = vld [vmem:[#allocation6 + $0x480] ss:$16 sps:$4 sm:$0xff]  }
  0x60   :  { %1304 = vmatpush1.bf16.msra.mxu1 %v2577_v40  ;;  %v2647_v31 = vld [vmem:[#allocation6 + $0x4a4] ss:$16 sps:$4 sm:$0xff]   ;;  %v2645_v33 = vld [vmem:[#allocation6 + $0x4a0] ss:$16 sps:$4 sm:$0xff]   ;;  %v2654_v40 = vld [vmem:[#allocation6 + $0xc8] ss:$16 sps:$4 sm:$0xff]  }
  0x61   :  { %1345 = vmatpush1.bf16.msra.mxu0 %v2578_v41  ;;  %1305 = vmatprep.subr.bf16.mxu1 %v2579_v42  ;;  %v2653_v35 = vld [vmem:[#allocation6 + $0x4c4] ss:$16 sps:$4 sm:$0xff]   ;;  %v2651_v39 = vld [vmem:[#allocation6 + $0x4c0] ss:$16 sps:$4 sm:$0xff]   ;;  %v2662_v42 = vld [vmem:[#allocation6 + $0xec] ss:$16 sps:$4 sm:$0xff]  }
  0x62   :  { %1346 = vmatprep.subr.bf16.mxu0 %v2581_v43  ;;  %v74_v37 = vld [vmem:[#allocation3 + $0x28] sm:$0xff] }
  0x63   :  { %v3109_v38 = vpack.c.bf16 %v74_v37, %v74_v37  ;;  %v2659_v41 = vld [vmem:[#allocation6 + $0x4e4] ss:$16 sps:$4 sm:$0xff]   ;;  %v2657_v43 = vld [vmem:[#allocation6 + $0x4e0] ss:$16 sps:$4 sm:$0xff]  }
  0x64   :  { %1306 = vmatpush1.bf16.msra.mxu1 %v2583_v44  ;;  %v2660_v44 = vld [vmem:[#allocation6 + $0xe8] ss:$16 sps:$4 sm:$0xff]   ;;  %v2669_v51 = vld [vmem:[#allocation6 + $0x520] ss:$16 sps:$4 sm:$0xff]   ;;  %v2701_v6 = vld [vmem:[#allocation6 + $0x5c4] ss:$16 sps:$4 sm:$0xff]  }
  0x65   :  { %1347 = vmatpush1.bf16.msra.mxu0 %v2584_v45  ;;  %1307 = vmatprep.subr.bf16.mxu1 %v2585_v46  ;;  %v2665_v45 = vld [vmem:[#allocation6 + $0x504] ss:$16 sps:$4 sm:$0xff]   ;;  %v2668_v46 = vld [vmem:[#allocation6 + $0x10c] ss:$16 sps:$4 sm:$0xff]   ;;  %v2699_v8 = vld [vmem:[#allocation6 + $0x5c0] ss:$16 sps:$4 sm:$0xff]  }
  0x66   :  { %1348 = vmatprep.subr.bf16.mxu0 %v2587_v47  ;;  %v2663_v47 = vld [vmem:[#allocation6 + $0x500] ss:$16 sps:$4 sm:$0xff]   ;;  %v2815_v37 = vld [vmem:[#allocation8 + $0x4] ss:$8 sps:$4 sm:$0xff]  }
  0x68   :  { %1308 = vmatpush1.bf16.msra.mxu1 %v2589_v49  ;;  %v2671_v49 = vld [vmem:[#allocation6 + $0x524] ss:$16 sps:$4 sm:$0xff]  }
  0x69   :  { %1349 = vmatpush1.bf16.msra.mxu0 %v2590_v52  ;;  %1309 = vmatprep.subr.bf16.mxu1 %v2591_v53  ;;  %v2672_v52 = vld [vmem:[#allocation6 + $0x128] ss:$16 sps:$4 sm:$0xff]   ;;  %v2677_v53 = vld [vmem:[#allocation6 + $0x544] ss:$16 sps:$4 sm:$0xff]  }
  0x6a   :  { %1350 = vmatprep.subr.bf16.mxu0 %v2593_v55  ;;  %v2680_v55 = vld [vmem:[#allocation6 + $0x14c] ss:$16 sps:$4 sm:$0xff]  }
  0x6c   :  { %1310 = vmatpush1.bf16.msra.mxu1 %v2595_v56  ;;  %v2675_v56 = vld [vmem:[#allocation6 + $0x540] ss:$16 sps:$4 sm:$0xff]  }
  0x6d   :  { %1351 = vmatpush1.bf16.msra.mxu0 %v2596_v57  ;;  %1311 = vmatprep.subr.bf16.mxu1 %v2597_v58  ;;  %v2678_v57 = vld [vmem:[#allocation6 + $0x148] ss:$16 sps:$4 sm:$0xff]   ;;  %v2683_v58 = vld [vmem:[#allocation6 + $0x564] ss:$16 sps:$4 sm:$0xff]  }
  0x6e   :  { %1352 = vmatprep.subr.bf16.mxu0 %v2599_v59  ;;  %v2686_v59 = vld [vmem:[#allocation6 + $0x16c] ss:$16 sps:$4 sm:$0xff]  }
  0x70   :  { %1312 = vmatpush1.bf16.msra.mxu1 %v2601_v60  ;;  %v2681_v60 = vld [vmem:[#allocation6 + $0x560] ss:$16 sps:$4 sm:$0xff]  }
  0x71   :  { %1353 = vmatpush1.bf16.msra.mxu0 %v2602_v61  ;;  %1313 = vmatprep.subr.bf16.mxu1 %v2603_v62  ;;  %v2684_v61 = vld [vmem:[#allocation6 + $0x168] ss:$16 sps:$4 sm:$0xff]   ;;  %v2689_v62 = vld [vmem:[#allocation6 + $0x584] ss:$16 sps:$4 sm:$0xff]  }
  0x72   :  { %1354 = vmatprep.subr.bf16.mxu0 %v2605_v63  ;;  %v2692_v63 = vld [vmem:[#allocation6 + $0x18c] ss:$16 sps:$4 sm:$0xff]  }
  0x74   :  { %1314 = vmatpush1.bf16.msra.mxu1 %v2607_v0  ;;  %v2687_v0 = vld [vmem:[#allocation6 + $0x580] ss:$16 sps:$4 sm:$0xff]  }
  0x75   :  { %1355 = vmatpush1.bf16.msra.mxu0 %v2608_v1  ;;  %1315 = vmatprep.subr.bf16.mxu1 %v2609_v2  ;;  %v2690_v1 = vld [vmem:[#allocation6 + $0x188] ss:$16 sps:$4 sm:$0xff]   ;;  %v2695_v2 = vld [vmem:[#allocation6 + $0x5a4] ss:$16 sps:$4 sm:$0xff]  }
  0x76   :  { %1356 = vmatprep.subr.bf16.mxu0 %v2611_v3  ;;  %v2698_v3 = vld [vmem:[#allocation6 + $0x1ac] ss:$16 sps:$4 sm:$0xff]  }
  0x78   :  { %1316 = vmatpush1.bf16.msra.mxu1 %v2613_v4  ;;  %v2693_v4 = vld [vmem:[#allocation6 + $0x5a0] ss:$16 sps:$4 sm:$0xff]  }
  0x79   :  { %1357 = vmatpush1.bf16.msra.mxu0 %v2614_v5  ;;  %1449 = vmatprep.subr.bf16.mxu1 %v2620_v9  ;;  %v2696_v5 = vld [vmem:[#allocation6 + $0x1a8] ss:$16 sps:$4 sm:$0xff]  }
  0x7a   :  { %1367 = vmatprep.subr.bf16.mxu0 %v2617_v7  ;;  %v2704_v7 = vld [vmem:[#allocation6 + $0x1cc] ss:$16 sps:$4 sm:$0xff]   ;;  %v2702_v9 = vld [vmem:[#allocation6 + $0x1c8] ss:$16 sps:$4 sm:$0xff]  }
  0x7b   :  { %1318 = vmatmul.mubr.bf16.vlgmr.msra.gmra.mrb[0].mxu1 %v3102_v10 }
  0x7c   :  { %1359 = vmatmul.mubr.bf16.vlgmr.msra.gmra.mrb[0].mxu0 %v3104_v13  ;;  %1450 = vmatpush1.bf16.msra.mxu1 %v2618_v12  ;;  %v2710_v12 = vld [vmem:[#allocation6 + $0x1ec] ss:$16 sps:$4 sm:$0xff]  }
  0x7d   :  { %1368 = vmatpush1.bf16.msra.mxu0 %v2615_v11  ;;  %1451 = vmatprep.subr.bf16.mxu1 %v2626_v15  ;;  %v2707_v11 = vld [vmem:[#allocation6 + $0x5e4] ss:$16 sps:$4 sm:$0xff]   ;;  %v2708_v15 = vld [vmem:[#allocation6 + $0x1e8] ss:$16 sps:$4 sm:$0xff]  }
  0x7e   :  { %1369 = vmatprep.subr.bf16.mxu0 %v2623_v14  ;;  %1481 = vmatprep.mubr.bf16.mxu1 %v3096_v50  ;;  %v2674_v50 = vld [vmem:[#allocation6 + $0x12c] ss:$16 sps:$4 sm:$0xff]   ;;  %v2705_v14 = vld [vmem:[#allocation6 + $0x5e0] ss:$16 sps:$4 sm:$0xff]  }
  0x7f   :  { %1399 = vmatprep.mubr.bf16.mxu0 %v3109_v38 }
  0x80   :  { %1452 = vmatpush1.bf16.msra.mxu1 %v2624_v17  ;;  %v2713_v17 = vld [vmem:[#allocation6 + $0x20c] ss:$16 sps:$4 sm:$0xff]  }
  0x81   :  { %1370 = vmatpush1.bf16.msra.mxu0 %v2621_v16  ;;  %1453 = vmatprep.subr.bf16.mxu1 %v2632_v20  ;;  %v73_v16 = vld [vmem:[#allocation3 + $0x20] sm:$0xff] }
  0x82   :  { %1371 = vmatprep.subr.bf16.mxu0 %v2629_v18  ;;  %v2719_v18 = vld [vmem:[#allocation6 + $0x604] ss:$16 sps:$4 sm:$0xff]   ;;  %v3112_v20 = vpack.c.bf16 %v73_v16, %v73_v16  ;;  %v2767_v16 = vld [vmem:[#allocation6 + $0x42c] ss:$16 sps:$4 sm:$0xff]  }
  0x84   :  { %1454 = vmatpush1.bf16.msra.mxu1 %v2630_v22  ;;  %v2717_v22 = vld [vmem:[#allocation6 + $0x600] ss:$16 sps:$4 sm:$0xff]  }
  0x85   :  { %1372 = vmatpush1.bf16.msra.mxu0 %v2627_v21  ;;  %1455 = vmatprep.subr.bf16.mxu1 %v2638_v24  ;;  %v2711_v21 = vld [vmem:[#allocation6 + $0x208] ss:$16 sps:$4 sm:$0xff]  }
  0x86   :  { %1373 = vmatprep.subr.bf16.mxu0 %v2635_v23  ;;  %v2716_v23 = vld [vmem:[#allocation6 + $0x22c] ss:$16 sps:$4 sm:$0xff]   ;;  %v2714_v24 = vld [vmem:[#allocation6 + $0x228] ss:$16 sps:$4 sm:$0xff]  }
  0x88   :  { %1456 = vmatpush1.bf16.msra.mxu1 %v2636_v26  ;;  %v2720_v26 = vld [vmem:[#allocation6 + $0x248] ss:$16 sps:$4 sm:$0xff]  }
  0x89   :  { %1374 = vmatpush1.bf16.msra.mxu0 %v2633_v25  ;;  %1457 = vmatprep.subr.bf16.mxu1 %v2644_v28  ;;  %v2722_v25 = vld [vmem:[#allocation6 + $0x24c] ss:$16 sps:$4 sm:$0xff]  }
  0x8a   :  { %1375 = vmatprep.subr.bf16.mxu0 %v2641_v27  ;;  %v75_v27 = vld [vmem:[#allocation3 + $0x30] sm:$0xff] }
  0x8b   :  { %v2725_v28 = vld [vmem:[#allocation6 + $0x26c] ss:$16 sps:$4 sm:$0xff]  }
  0x8c   :  { %1458 = vmatpush1.bf16.msra.mxu1 %v2642_v30  ;;  %v3118_v30 = vpack.c.bf16 %v75_v27, %v75_v27  ;;  %v2849_v27 = vld [vmem:[#allocation8 + $0xc0] ss:$8 sps:$4 sm:$0xff]  }
  0x8d   :  { %1376 = vmatpush1.bf16.msra.mxu0 %v2639_v29  ;;  %1459 = vmatprep.subr.bf16.mxu1 %v2650_v32  ;;  %v2723_v29 = vld [vmem:[#allocation6 + $0x268] ss:$16 sps:$4 sm:$0xff]   ;;  %v2731_v32 = vld [vmem:[#allocation6 + $0x2ac] ss:$16 sps:$4 sm:$0xff]  }
  0x8e   :  { %1377 = vmatprep.subr.bf16.mxu0 %v2647_v31  ;;  %v2728_v31 = vld [vmem:[#allocation6 + $0x28c] ss:$16 sps:$4 sm:$0xff]  }
  0x90   :  { %1460 = vmatpush1.bf16.msra.mxu1 %v2648_v34  ;;  %v2734_v34 = vld [vmem:[#allocation6 + $0x2cc] ss:$16 sps:$4 sm:$0xff]  }
  0x91   :  { %1378 = vmatpush1.bf16.msra.mxu0 %v2645_v33  ;;  %1461 = vmatprep.subr.bf16.mxu1 %v2656_v36  ;;  %v2729_v33 = vld [vmem:[#allocation6 + $0x2a8] ss:$16 sps:$4 sm:$0xff]  }
  0x92   :  { %1379 = vmatprep.subr.bf16.mxu0 %v2653_v35  ;;  %v2737_v35 = vld [vmem:[#allocation6 + $0x2ec] ss:$16 sps:$4 sm:$0xff]   ;;  %v2813_v36 = vld [vmem:[#allocation8] ss:$8 sps:$4 sm:$0xff]  }
  0x94   :  { %1462 = vmatpush1.bf16.msra.mxu1 %v2654_v40  ;;  %v2735_v40 = vld [vmem:[#allocation6 + $0x2e8] ss:$16 sps:$4 sm:$0xff]  }
  0x95   :  { %1380 = vmatpush1.bf16.msra.mxu0 %v2651_v39  ;;  %1463 = vmatprep.subr.bf16.mxu1 %v2662_v42  ;;  %v2818_v39 = vld [vmem:[#allocation8 + $0x14] ss:$8 sps:$4 sm:$0xff]  }
  0x96   :  { %1381 = vmatprep.subr.bf16.mxu0 %v2659_v41  ;;  %v2816_v41 = vld [vmem:[#allocation8 + $0x10] ss:$8 sps:$4 sm:$0xff]   ;;  %v2740_v42 = vld [vmem:[#allocation6 + $0x30c] ss:$16 sps:$4 sm:$0xff]  }
  0x98   :  { %1464 = vmatpush1.bf16.msra.mxu1 %v2660_v44  ;;  %v2738_v44 = vld [vmem:[#allocation6 + $0x308] ss:$16 sps:$4 sm:$0xff]  }
  0x99   :  { %1382 = vmatpush1.bf16.msra.mxu0 %v2657_v43  ;;  %1465 = vmatprep.subr.bf16.mxu1 %v2668_v46  ;;  %v2821_v43 = vld [vmem:[#allocation8 + $0x24] ss:$8 sps:$4 sm:$0xff]  }
  0x9a   :  { %1383 = vmatprep.subr.bf16.mxu0 %v2665_v45  ;;  %v2819_v45 = vld [vmem:[#allocation8 + $0x20] ss:$8 sps:$4 sm:$0xff]   ;;  %v2743_v46 = vld [vmem:[#allocation6 + $0x32c] ss:$16 sps:$4 sm:$0xff]  }
  0x9c   :  { %1466 = vmatpush1.bf16.msra.mxu1 %v2666_v48  ;;  %v2741_v48 = vld [vmem:[#allocation6 + $0x328] ss:$16 sps:$4 sm:$0xff]  }
  0x9d   :  { %1384 = vmatpush1.bf16.msra.mxu0 %v2663_v47  ;;  %1467 = vmatprep.subr.bf16.mxu1 %v2674_v50  ;;  %v2824_v47 = vld [vmem:[#allocation8 + $0x34] ss:$8 sps:$4 sm:$0xff]  }
  0x9e   :  { %1385 = vmatprep.subr.bf16.mxu0 %v2671_v49  ;;  %v2822_v49 = vld [vmem:[#allocation8 + $0x30] ss:$8 sps:$4 sm:$0xff]   ;;  %v2746_v50 = vld [vmem:[#allocation6 + $0x34c] ss:$16 sps:$4 sm:$0xff]  }
  0xa0   :  { %1468 = vmatpush1.bf16.msra.mxu1 %v2672_v52  ;;  %v2744_v52 = vld [vmem:[#allocation6 + $0x348] ss:$16 sps:$4 sm:$0xff]  }
  0xa1   :  { %1386 = vmatpush1.bf16.msra.mxu0 %v2669_v51  ;;  %1469 = vmatprep.subr.bf16.mxu1 %v2680_v55  ;;  %v2827_v51 = vld [vmem:[#allocation8 + $0x44] ss:$8 sps:$4 sm:$0xff]  }
  0xa2   :  { %1387 = vmatprep.subr.bf16.mxu0 %v2677_v53  ;;  %v2825_v53 = vld [vmem:[#allocation8 + $0x40] ss:$8 sps:$4 sm:$0xff]   ;;  %v2749_v55 = vld [vmem:[#allocation6 + $0x36c] ss:$16 sps:$4 sm:$0xff]  }
  0xa4   :  { %1470 = vmatpush1.bf16.msra.mxu1 %v2678_v57  ;;  %v2747_v57 = vld [vmem:[#allocation6 + $0x368] ss:$16 sps:$4 sm:$0xff]  }
  0xa5   :  { %1388 = vmatpush1.bf16.msra.mxu0 %v2675_v56  ;;  %1471 = vmatprep.subr.bf16.mxu1 %v2686_v59  ;;  %v2830_v56 = vld [vmem:[#allocation8 + $0x54] ss:$8 sps:$4 sm:$0xff]  }
  0xa6   :  { %1389 = vmatprep.subr.bf16.mxu0 %v2683_v58  ;;  %v2828_v58 = vld [vmem:[#allocation8 + $0x50] ss:$8 sps:$4 sm:$0xff]   ;;  %v2752_v59 = vld [vmem:[#allocation6 + $0x38c] ss:$16 sps:$4 sm:$0xff]  }
  0xa8   :  { %1472 = vmatpush1.bf16.msra.mxu1 %v2684_v61  ;;  %v2750_v61 = vld [vmem:[#allocation6 + $0x388] ss:$16 sps:$4 sm:$0xff]  }
  0xa9   :  { %1390 = vmatpush1.bf16.msra.mxu0 %v2681_v60  ;;  %1473 = vmatprep.subr.bf16.mxu1 %v2692_v63  ;;  %v2833_v60 = vld [vmem:[#allocation8 + $0x64] ss:$8 sps:$4 sm:$0xff]  }
  0xaa   :  { %1391 = vmatprep.subr.bf16.mxu0 %v2689_v62  ;;  %v2831_v62 = vld [vmem:[#allocation8 + $0x60] ss:$8 sps:$4 sm:$0xff]   ;;  %v2755_v63 = vld [vmem:[#allocation6 + $0x3ac] ss:$16 sps:$4 sm:$0xff]  }
  0xac   :  { %1474 = vmatpush1.bf16.msra.mxu1 %v2690_v1  ;;  %v2753_v1 = vld [vmem:[#allocation6 + $0x3a8] ss:$16 sps:$4 sm:$0xff]  }
  0xad   :  { %1392 = vmatpush1.bf16.msra.mxu0 %v2687_v0  ;;  %1475 = vmatprep.subr.bf16.mxu1 %v2698_v3  ;;  %v2836_v0 = vld [vmem:[#allocation8 + $0x74] ss:$8 sps:$4 sm:$0xff]  }
  0xae   :  { %1393 = vmatprep.subr.bf16.mxu0 %v2695_v2  ;;  %v2834_v2 = vld [vmem:[#allocation8 + $0x70] ss:$8 sps:$4 sm:$0xff]   ;;  %v2758_v3 = vld [vmem:[#allocation6 + $0x3cc] ss:$16 sps:$4 sm:$0xff]  }
  0xb0   :  { %1476 = vmatpush1.bf16.msra.mxu1 %v2696_v5  ;;  %v2756_v5 = vld [vmem:[#allocation6 + $0x3c8] ss:$16 sps:$4 sm:$0xff]  }
  0xb1   :  { %1394 = vmatpush1.bf16.msra.mxu0 %v2693_v4  ;;  %1477 = vmatprep.subr.bf16.mxu1 %v2704_v7  ;;  %v2839_v4 = vld [vmem:[#allocation8 + $0x84] ss:$8 sps:$4 sm:$0xff]  }
  0xb2   :  { %1395 = vmatprep.subr.bf16.mxu0 %v2701_v6  ;;  %v2837_v6 = vld [vmem:[#allocation8 + $0x80] ss:$8 sps:$4 sm:$0xff]   ;;  %v2761_v7 = vld [vmem:[#allocation6 + $0x3ec] ss:$16 sps:$4 sm:$0xff]  }
  0xb4   :  { %1478 = vmatpush1.bf16.msra.mxu1 %v2702_v9  ;;  %v2759_v9 = vld [vmem:[#allocation6 + $0x3e8] ss:$16 sps:$4 sm:$0xff]  }
  0xb5   :  { %1396 = vmatpush1.bf16.msra.mxu0 %v2699_v8  ;;  %1479 = vmatprep.subr.bf16.mxu1 %v2710_v12  ;;  %v2842_v8 = vld [vmem:[#allocation8 + $0x94] ss:$8 sps:$4 sm:$0xff]  }
  0xb6   :  { %1397 = vmatprep.subr.bf16.mxu0 %v2707_v11  ;;  %v2840_v11 = vld [vmem:[#allocation8 + $0x90] ss:$8 sps:$4 sm:$0xff]   ;;  %v2764_v12 = vld [vmem:[#allocation6 + $0x40c] ss:$16 sps:$4 sm:$0xff]  }
  0xb8   :  { %1480 = vmatpush1.bf16.msra.mxu1 %v2708_v15  ;;  %v2762_v15 = vld [vmem:[#allocation6 + $0x408] ss:$16 sps:$4 sm:$0xff]  }
  0xb9   :  { %1398 = vmatpush1.bf16.msra.mxu0 %v2705_v14  ;;  %1490 = vmatprep.subr.bf16.mxu1 %v2713_v17  ;;  %v2845_v14 = vld [vmem:[#allocation8 + $0xa4] ss:$8 sps:$4 sm:$0xff]   ;;  %v2843_v17 = vld [vmem:[#allocation8 + $0xa0] ss:$8 sps:$4 sm:$0xff]  }
  0xba   :  { %1408 = vmatprep.subr.bf16.mxu0 %v2719_v18  ;;  %v2848_v18 = vld [vmem:[#allocation8 + $0xb4] ss:$8 sps:$4 sm:$0xff]  }
  0xbb   :  { %1482 = vmatmul.mubr.bf16.vlgmr.msra.gmra.mrb[4].mxu1 %v3102_v10  ;;  %v2726_v10 = vld [vmem:[#allocation6 + $0x288] ss:$16 sps:$4 sm:$0xff]  }
  0xbc   :  { %1400 = vmatmul.mubr.bf16.vlgmr.msra.gmra.mrb[0].mxu0 %v3112_v20  ;;  %1491 = vmatpush1.bf16.msra.mxu1 %v2711_v21  ;;  %v2765_v21 = vld [vmem:[#allocation6 + $0x428] ss:$16 sps:$4 sm:$0xff]  }
  0xbd   :  { %1409 = vmatpush1.bf16.msra.mxu0 %v2717_v22  ;;  %1492 = vmatprep.subr.bf16.mxu1 %v2716_v23  ;;  %v2770_v22 = vld [vmem:[#allocation6 + $0x44c] ss:$16 sps:$4 sm:$0xff]   ;;  %v2846_v23 = vld [vmem:[#allocation8 + $0xb0] ss:$8 sps:$4 sm:$0xff]  }
  0xbe   :  { %1440 = vmatprep.mubr.bf16.mxu0 %v3014_v19  ;;  %1522 = vmatprep.mubr.bf16.mxu1 %v3098_v54  ;;  %v2732_v54 = vld [vmem:[#allocation6 + $0x2c8] ss:$16 sps:$4 sm:$0xff]  }
  0xbf   :  { %2021 = vmatprep.subr.bf16.mxu0 %v2815_v37  ;;  %v2786_v37 = vld [vmem:[#allocation6 + $0x508] ss:$16 sps:$4 sm:$0xff]  }
  0xc0   :  { %1493 = vmatpush1.bf16.msra.mxu1 %v2714_v24  ;;  %v2851_v24 = vld [vmem:[#allocation8 + $0xc4] ss:$8 sps:$4 sm:$0xff]  }
  0xc1   :  { %1494 = vmatprep.subr.bf16.mxu1 %v2722_v25  ;;  %v2768_v25 = vld [vmem:[#allocation6 + $0x448] ss:$16 sps:$4 sm:$0xff]  }
  0xc4   :  { %1495 = vmatpush1.bf16.msra.mxu1 %v2720_v26  ;;  %v2773_v26 = vld [vmem:[#allocation6 + $0x46c] ss:$16 sps:$4 sm:$0xff]  }
  0xc5   :  { %1496 = vmatprep.subr.bf16.mxu1 %v2725_v28  ;;  %v2854_v28 = vld [vmem:[#allocation8 + $0xd4] ss:$8 sps:$4 sm:$0xff]  }
  0xc8   :  { %2410 = vmatmul.mubr.msk.bf16.vlgmr.msra.gmra.mrb[0].mxu0 %vm1281_vm0, %v3118_v30  ;;  %1497 = vmatpush1.bf16.msra.mxu1 %v2723_v29  ;;  %v2776_v29 = vld [vmem:[#allocation6 + $0x48c] ss:$16 sps:$4 sm:$0xff]  }
  0xc9   :  { %1498 = vmatprep.subr.bf16.mxu1 %v2728_v31  ;;  %2022 = vmatpush1.bf16.msra.mxu0 %v2813_v36  ;;  %v2774_v31 = vld [vmem:[#allocation6 + $0x488] ss:$16 sps:$4 sm:$0xff]   ;;  %v2788_v36 = vld [vmem:[#allocation6 + $0x50c] ss:$16 sps:$4 sm:$0xff]  }
  0xca   :  { %2023 = vmatprep.subr.bf16.mxu0 %v2818_v39  ;;  %v2791_v39 = vld [vmem:[#allocation6 + $0x52c] ss:$16 sps:$4 sm:$0xff]  }
  0xcc   :  { %1499 = vmatpush1.bf16.msra.mxu1 %v2726_v10  ;;  %v2779_v10 = vld [vmem:[#allocation6 + $0x4ac] ss:$16 sps:$4 sm:$0xff]  }
  0xcd   :  { %1500 = vmatprep.subr.bf16.mxu1 %v2731_v32  ;;  %2024 = vmatpush1.bf16.msra.mxu0 %v2816_v41  ;;  %v2777_v32 = vld [vmem:[#allocation6 + $0x4a8] ss:$16 sps:$4 sm:$0xff]  }
  0xce   :  { %2025 = vmatprep.subr.bf16.mxu0 %v2821_v43  ;;  %v2789_v41 = vld [vmem:[#allocation6 + $0x528] ss:$16 sps:$4 sm:$0xff]   ;;  %v2794_v43 = vld [vmem:[#allocation6 + $0x54c] ss:$16 sps:$4 sm:$0xff]  }
  0xd0   :  { %1501 = vmatpush1.bf16.msra.mxu1 %v2729_v33  ;;  %v2782_v33 = vld [vmem:[#allocation6 + $0x4cc] ss:$16 sps:$4 sm:$0xff]  }
  0xd1   :  { %1502 = vmatprep.subr.bf16.mxu1 %v2734_v34  ;;  %2026 = vmatpush1.bf16.msra.mxu0 %v2819_v45  ;;  %v2780_v34 = vld [vmem:[#allocation6 + $0x4c8] ss:$16 sps:$4 sm:$0xff]  }
  0xd2   :  { %2027 = vmatprep.subr.bf16.mxu0 %v2824_v47  ;;  %v2792_v45 = vld [vmem:[#allocation6 + $0x548] ss:$16 sps:$4 sm:$0xff]   ;;  %v2797_v47 = vld [vmem:[#allocation6 + $0x56c] ss:$16 sps:$4 sm:$0xff]  }
  0xd4   :  { %1503 = vmatpush1.bf16.msra.mxu1 %v2732_v54  ;;  %v2785_v54 = vld [vmem:[#allocation6 + $0x4ec] ss:$16 sps:$4 sm:$0xff]  }
  0xd5   :  { %1504 = vmatprep.subr.bf16.mxu1 %v2737_v35  ;;  %2028 = vmatpush1.bf16.msra.mxu0 %v2822_v49  ;;  %v2783_v35 = vld [vmem:[#allocation6 + $0x4e8] ss:$16 sps:$4 sm:$0xff]   ;;  %v2800_v49 = vld [vmem:[#allocation6 + $0x58c] ss:$16 sps:$4 sm:$0xff]  }
  0xd6   :  { %2029 = vmatprep.subr.bf16.mxu0 %v2827_v51  ;;  %v2798_v51 = vld [vmem:[#allocation6 + $0x588] ss:$16 sps:$4 sm:$0xff]  }
  0xd8   :  { %1505 = vmatpush1.bf16.msra.mxu1 %v2735_v40  ;;  %v2857_v40 = vld [vmem:[#allocation8 + $0xe4] ss:$8 sps:$4 sm:$0xff]  }
  0xd9   :  { %1506 = vmatprep.subr.bf16.mxu1 %v2740_v42  ;;  %2030 = vmatpush1.bf16.msra.mxu0 %v2825_v53  ;;  %v2855_v42 = vld [vmem:[#allocation8 + $0xe0] ss:$8 sps:$4 sm:$0xff]  }
  0xda   :  { %2031 = vmatprep.subr.bf16.mxu0 %v2830_v56  ;;  %v2801_v53 = vld [vmem:[#allocation6 + $0x5a8] ss:$16 sps:$4 sm:$0xff]  }
  0xdb   :  { %v2804_v56 = vld [vmem:[#allocation6 + $0x5c8] ss:$16 sps:$4 sm:$0xff]  }
  0xdc   :  { %1507 = vmatpush1.bf16.msra.mxu1 %v2738_v44  ;;  %v2860_v44 = vld [vmem:[#allocation8 + $0xf4] ss:$8 sps:$4 sm:$0xff]  }
  0xdd   :  { %1508 = vmatprep.subr.bf16.mxu1 %v2743_v46  ;;  %2032 = vmatpush1.bf16.msra.mxu0 %v2828_v58  ;;  %v2858_v46 = vld [vmem:[#allocation8 + $0xf0] ss:$8 sps:$4 sm:$0xff]  }
  0xde   :  { %2033 = vmatprep.subr.bf16.mxu0 %v2833_v60  ;;  %v2807_v58 = vld [vmem:[#allocation6 + $0x5e8] ss:$16 sps:$4 sm:$0xff]  }
  0xdf   :  { %v2810_v60 = vld [vmem:[#allocation6 + $0x608] ss:$16 sps:$4 sm:$0xff]  }
  0xe0   :  { %1509 = vmatpush1.bf16.msra.mxu1 %v2741_v48  ;;  %v2795_v48 = vld [vmem:[#allocation6 + $0x568] ss:$16 sps:$4 sm:$0xff]  }
  0xe1   :  { %1510 = vmatprep.subr.bf16.mxu1 %v2746_v50  ;;  %2034 = vmatpush1.bf16.msra.mxu0 %v2831_v62  ;;  %v2863_v50 = vld [vmem:[#allocation8 + $0x104] ss:$8 sps:$4 sm:$0xff]  }
  0xe2   :  { %2035 = vmatprep.subr.bf16.mxu0 %v2836_v0 }
  0xe4   :  { %1511 = vmatpush1.bf16.msra.mxu1 %v2744_v52  ;;  %v2803_v52 = vld [vmem:[#allocation6 + $0x5ac] ss:$16 sps:$4 sm:$0xff]  }
  0xe5   :  { %1512 = vmatprep.subr.bf16.mxu1 %v2749_v55  ;;  %2036 = vmatpush1.bf16.msra.mxu0 %v2834_v2  ;;  %v2806_v55 = vld [vmem:[#allocation6 + $0x5cc] ss:$16 sps:$4 sm:$0xff]  }
  0xe6   :  { %2037 = vmatprep.subr.bf16.mxu0 %v2839_v4 }
  0xe8   :  { %1513 = vmatpush1.bf16.msra.mxu1 %v2747_v57  ;;  %v2809_v57 = vld [vmem:[#allocation6 + $0x5ec] ss:$16 sps:$4 sm:$0xff]  }
  0xe9   :  { %1514 = vmatprep.subr.bf16.mxu1 %v2752_v59  ;;  %2038 = vmatpush1.bf16.msra.mxu0 %v2837_v6  ;;  %v2812_v59 = vld [vmem:[#allocation6 + $0x60c] ss:$16 sps:$4 sm:$0xff]  }
  0xea   :  { %2039 = vmatprep.subr.bf16.mxu0 %v2842_v8 }
  0xec   :  { %1515 = vmatpush1.bf16.msra.mxu1 %v2750_v61 }
  0xed   :  { %1516 = vmatprep.subr.bf16.mxu1 %v2755_v63  ;;  %2040 = vmatpush1.bf16.msra.mxu0 %v2840_v11 }
  0xee   :  { %2041 = vmatprep.subr.bf16.mxu0 %v2845_v14 }
  0xf0   :  { %1517 = vmatpush1.bf16.msra.mxu1 %v2753_v1  ;;  %v281_v1 = vlaneseq }
  0xf1   :  { %1518 = vmatprep.subr.bf16.mxu1 %v2758_v3  ;;  %2042 = vmatpush1.bf16.msra.mxu0 %v2843_v17 }
  0xf2   :  { %2043 = vmatprep.subr.bf16.mxu0 %v2848_v18  ;;  %v3128_v2 = vshrl.u32 %v281_v1, 7 }
  0xf4   :  { %1519 = vmatpush1.bf16.msra.mxu1 %v2756_v5  ;;  %v3131_v3 = vsub.s32 0, %v3128_v2 }
  0xf5   :  { %1520 = vmatprep.subr.bf16.mxu1 %v2761_v7  ;;  %2044 = vmatpush1.bf16.msra.mxu0 %v2846_v23 }
  0xf6   :  { %2045 = vmatprep.subr.bf16.mxu0 %v2851_v24  ;;  %v2866_v24 = vld [vmem:[#allocation8 + $0x114] ss:$8 sps:$4 sm:$0xff]  }
  0xf8   :  { %1521 = vmatpush1.bf16.msra.mxu1 %v2759_v9 }
  0xf9   :  { %1531 = vmatprep.subr.bf16.mxu1 %v2764_v12  ;;  %2046 = vmatpush1.bf16.msra.mxu0 %v2849_v27  ;;  %v2867_v27 = vld [vmem:[#allocation8 + $0x120] ss:$8 sps:$4 sm:$0xff]  }
  0xfa   :  { %2047 = vmatprep.subr.bf16.mxu0 %v2854_v28  ;;  %v2872_v28 = vld [vmem:[#allocation8 + $0x134] ss:$8 sps:$4 sm:$0xff]  }
  0xfb   :  { %1523 = vmatmul.mubr.bf16.vlgmr.msra.gmra.mrb[4].mxu1 %v3104_v13  ;;  %v2771_v13 = vld [vmem:[#allocation6 + $0x468] ss:$16 sps:$4 sm:$0xff]  }
  0xfc   :  { %1532 = vmatpush1.bf16.msra.mxu1 %v2762_v15  ;;  %1563 = vmatprep.mubr.bf16.mxu1 %v3109_v38  ;;  %v2852_v38 = vld [vmem:[#allocation8 + $0xd0] ss:$8 sps:$4 sm:$0xff]  }
  0xfd   :  { %1533 = vmatprep.subr.bf16.mxu1 %v2767_v16  ;;  %2048 = vmatpush1.bf16.msra.mxu0 %v2852_v38  ;;  %v2873_v38 = vld [vmem:[#allocation8 + $0x140] ss:$8 sps:$4 sm:$0xff]  }
  0xfe   :  { %2049 = vmatprep.subr.bf16.mxu0 %v2857_v40  ;;  %v2893_v40 = vld [vmem:[#allocation8 + $0x1a4] ss:$8 sps:$4 sm:$0xff]  }
 0x100   :  { %1534 = vmatpush1.bf16.msra.mxu1 %v2765_v21 }
 0x101   :  { %1535 = vmatprep.subr.bf16.mxu1 %v2770_v22  ;;  %2050 = vmatpush1.bf16.msra.mxu0 %v2855_v42  ;;  %v2861_v22 = vld [vmem:[#allocation8 + $0x100] ss:$8 sps:$4 sm:$0xff]   ;;  %v2896_v42 = vld [vmem:[#allocation8 + $0x1b4] ss:$8 sps:$4 sm:$0xff]  }
 0x102   :  { %2051 = vmatprep.subr.bf16.mxu0 %v2860_v44  ;;  %v2899_v44 = vld [vmem:[#allocation8 + $0x1c4] ss:$8 sps:$4 sm:$0xff]  }
 0x104   :  { %1536 = vmatpush1.bf16.msra.mxu1 %v2768_v25  ;;  %v2864_v25 = vld [vmem:[#allocation8 + $0x110] ss:$8 sps:$4 sm:$0xff]  }
 0x105   :  { %1537 = vmatprep.subr.bf16.mxu1 %v2773_v26  ;;  %2052 = vmatpush1.bf16.msra.mxu0 %v2858_v46  ;;  %v2869_v26 = vld [vmem:[#allocation8 + $0x124] ss:$8 sps:$4 sm:$0xff]   ;;  %v2902_v46 = vld [vmem:[#allocation8 + $0x1d4] ss:$8 sps:$4 sm:$0xff]  }
 0x106   :  { %2062 = vmatprep.subr.bf16.mxu0 %v2863_v50  ;;  %v2908_v50 = vld [vmem:[#allocation8 + $0x1f4] ss:$8 sps:$4 sm:$0xff]  }
 0x108   :  { %1538 = vmatpush1.bf16.msra.mxu1 %v2771_v13  ;;  %v2870_v13 = vld [vmem:[#allocation8 + $0x130] ss:$8 sps:$4 sm:$0xff]  }
 0x109   :  { %1539 = vmatprep.subr.bf16.mxu1 %v2776_v29  ;;  %v2875_v29 = vld [vmem:[#allocation8 + $0x144] ss:$8 sps:$4 sm:$0xff]  }
 0x10c   :  { %1540 = vmatpush1.bf16.msra.mxu1 %v2774_v31  ;;  %v2878_v31 = vld [vmem:[#allocation8 + $0x154] ss:$8 sps:$4 sm:$0xff]  }
 0x10d   :  { %1541 = vmatprep.subr.bf16.mxu1 %v2779_v10  ;;  %v2876_v10 = vld [vmem:[#allocation8 + $0x150] ss:$8 sps:$4 sm:$0xff]  }
 0x110   :  { %1542 = vmatpush1.bf16.msra.mxu1 %v2777_v32  ;;  %v2881_v32 = vld [vmem:[#allocation8 + $0x164] ss:$8 sps:$4 sm:$0xff]  }
 0x111   :  { %1543 = vmatprep.subr.bf16.mxu1 %v2782_v33  ;;  %v2879_v33 = vld [vmem:[#allocation8 + $0x160] ss:$8 sps:$4 sm:$0xff]  }
 0x114   :  { %1544 = vmatpush1.bf16.msra.mxu1 %v2780_v34  ;;  %v2884_v34 = vld [vmem:[#allocation8 + $0x174] ss:$8 sps:$4 sm:$0xff]  }
 0x115   :  { %1545 = vmatprep.subr.bf16.mxu1 %v2785_v54  ;;  %v2882_v54 = vld [vmem:[#allocation8 + $0x170] ss:$8 sps:$4 sm:$0xff]  }
 0x118   :  { %1546 = vmatpush1.bf16.msra.mxu1 %v2783_v35  ;;  %v2887_v35 = vld [vmem:[#allocation8 + $0x184] ss:$8 sps:$4 sm:$0xff]  }
 0x119   :  { %1547 = vmatprep.subr.bf16.mxu1 %v2788_v36  ;;  %v2885_v36 = vld [vmem:[#allocation8 + $0x180] ss:$8 sps:$4 sm:$0xff]  }
 0x11c   :  { %1548 = vmatpush1.bf16.msra.mxu1 %v2786_v37  ;;  %v2890_v37 = vld [vmem:[#allocation8 + $0x194] ss:$8 sps:$4 sm:$0xff]  }
 0x11d   :  { %1549 = vmatprep.subr.bf16.mxu1 %v2791_v39  ;;  %v2888_v39 = vld [vmem:[#allocation8 + $0x190] ss:$8 sps:$4 sm:$0xff]  }
 0x120   :  { %1550 = vmatpush1.bf16.msra.mxu1 %v2789_v41  ;;  %v2891_v41 = vld [vmem:[#allocation8 + $0x1a0] ss:$8 sps:$4 sm:$0xff]  }
 0x121   :  { %1551 = vmatprep.subr.bf16.mxu1 %v2794_v43  ;;  %v2894_v43 = vld [vmem:[#allocation8 + $0x1b0] ss:$8 sps:$4 sm:$0xff]  }
 0x124   :  { %1552 = vmatpush1.bf16.msra.mxu1 %v2792_v45  ;;  %v2897_v45 = vld [vmem:[#allocation8 + $0x1c0] ss:$8 sps:$4 sm:$0xff]  }
 0x125   :  { %1553 = vmatprep.subr.bf16.mxu1 %v2797_v47  ;;  %v2900_v47 = vld [vmem:[#allocation8 + $0x1d0] ss:$8 sps:$4 sm:$0xff]  }
 0x128   :  { %1554 = vmatpush1.bf16.msra.mxu1 %v2795_v48  ;;  %v2905_v48 = vld [vmem:[#allocation8 + $0x1e4] ss:$8 sps:$4 sm:$0xff]  }
 0x129   :  { %1555 = vmatprep.subr.bf16.mxu1 %v2800_v49  ;;  %v2903_v49 = vld [vmem:[#allocation8 + $0x1e0] ss:$8 sps:$4 sm:$0xff]  }
 0x12c   :  { %1556 = vmatpush1.bf16.msra.mxu1 %v2798_v51  ;;  %v2906_v51 = vld [vmem:[#allocation8 + $0x1f0] ss:$8 sps:$4 sm:$0xff]  }
 0x12d   :  { %1557 = vmatprep.subr.bf16.mxu1 %v2803_v52  ;;  %v291_v52 = vsub.s32 2, %v3128_v2 }
 0x130   :  { %1558 = vmatpush1.bf16.msra.mxu1 %v2801_v53  ;;  %v295_v53 = vsub.s32 3, %v3128_v2 }
 0x131   :  { %1559 = vmatprep.subr.bf16.mxu1 %v2806_v55 }
 0x134   :  { %1560 = vmatpush1.bf16.msra.mxu1 %v2804_v56 }
 0x135   :  { %1561 = vmatprep.subr.bf16.mxu1 %v2809_v57 }
 0x138   :  { %1562 = vmatpush1.bf16.msra.mxu1 %v2807_v58 }
 0x139   :  { %1572 = vmatprep.subr.bf16.mxu1 %v2812_v59 }
 0x13b   :  { %1564 = vmatmul.mubr.bf16.vlgmr.msra.gmra.mrb[4].mxu1 %v3112_v20  ;;  %v3136_v20 = vld [vmem:[%s3175_s2] sm:$0xf] }
 0x13c   :  { %1573 = vmatpush1.bf16.msra.mxu1 %v2810_v60  ;;  %1604 = vmatprep.mubr.bf16.mxu1 %v3014_v19  ;;  %v287_v19 = vsub.s32 1, %v3128_v2  ;;  %v292_v55 = vrot.slane %v3136_v20, %v291_v52  ;;  %v296_v56 = vrot.slane %v3136_v20, %v295_v53 }
 0x13e   :  { %v288_v4 = vrot.slane %v3136_v20, %v287_v19 }
 0x147   :  { %2411 = vmatmul.mubr.msk.bf16.vlgmr.msra.gmra.mrb[4].mxu1 %vm1281_vm0, %v3118_v30  ;;  %v284_v30 = vrot.slane %v3136_v20, %v3131_v3  ;;  %v2179_v20 = vld [vmem:[#allocation2] sm:$0x1] }
 0x148   :  { %2182 = vperm.xlu0 %2518, %v2179_v20  }
 0x14e   :  { %v1319_v61 = vpop.f32.mrb[0].mxu1 }
 0x14f   :  { %v1321_v62 = vpop.f32.mrb[1].mxu1  ;;  %v1320_v5 = vadd.f32 %v1319_v61, %v284_v30 }
 0x150   :  { %v1323_v63 = vpop.f32.mrb[2].mxu1  ;;  %v1322_v6 = vadd.f32 %v1321_v62, %v288_v4 }
 0x151   :  { %v1324_v0 = vpop.f32.mrb[3].mxu1 }
 0x19b   :  { %v1442_v7 = vpop.f32.mrb[0].mxu0 }
 0x19c   :  { %v2478_v8 = vadd.f32 %v1442_v7, %v1320_v5  ;;  %v1444_v9 = vpop.f32.mrb[1].mxu0  ;;  %v1689_v7 = vld [vmem:[%s3177_s4] sm:$0x3]  ;;  %s3015_s4 = smov [#allocation9]  }
 0x19d   :  { %v2480_v11 = vadd.f32 %v1444_v9, %v1322_v6  ;;  %v1446_v12 = vpop.f32.mrb[2].mxu0  ;;  %v2108_v6 = vld [vmem:[%s3178_s5 + $0x8] sm:$0xff]  ;;  %v1698_v9 = vrot.slane %v1689_v7, %v287_v19  ;;  %s2204_s22 = sshll.u32 %s3015_s4, 4  ;;  %s2205_s22 = int_to_ptr.vmem [resolvable:$true] %s2204_s22 }
 0x19e   :  { %v1613_v14 = vmul.f32 0.01, %v2478_v8  ;;  %v1447_v15 = vpop.f32.mrb[3].mxu0  ;;  %2173 = vmatprep.mubr.f32.mxu1 %v2108_v6  ;;  %s2979_s23 = scalar_lea.vmem %s2205_s22, 16  ;;  %p2984_p11 = scmp.lt.s32.totalorder %s2205_s22, %s2205_s22 }
 0x19f   :  { %v1614_v16 = vmul.f32 0.01, %v2480_v11  ;;  %p2980_p10 = scmp.ne.s32.totalorder %s2205_s22, %s2979_s23 }
 0x1a0   :  { %v1617_v17 = vmax.f32 %v2478_v8, %v1613_v14  ;;  %v1694_v8 = vrot.slane %v1689_v7, %v3131_v3 }
 0x1a1   :  { %v1618_v18 = vmax.f32 %v2480_v11, %v1614_v16 }
 0x1a2   :  { %v1621_v23 = vpack.c.bf16 %v1617_v17, %v1617_v17 }
 0x1a3   :  { %v1622_v21 = vpack.c.bf16 %v1618_v18, %v1618_v18 }
 0x1a5   :  { %2053 = vmatprep.mubr.bf16.mxu0 %v1622_v21 }
 0x1a6   :  { %2054 = vmatmul.mubr.bf16.vlgmr.msra.gmra.mrb[4].mxu0 %v1621_v23 }
 0x1a7   :  { %2063 = vmatpush1.bf16.msra.mxu0 %v2861_v22 }
 0x1a8   :  { %2064 = vmatprep.subr.bf16.mxu0 %v2866_v24  ;;  %v2107_v24 = vld [vmem:[%s3178_s5] sm:$0xff]  ;;  %s2983_s5 = scalar_lea.vmem %s2205_s22, 32 }
 0x1a9   :  { %p2985_p12 = scmp.lt.s32.totalorder %s2983_s5, %s2979_s23 }
 0x1ab   :  { %2065 = vmatpush1.bf16.msra.mxu0 %v2864_v25  ;;  %p2986_p13 = por %p2985_p12, %p2984_p11 }
 0x1ac   :  { %2066 = vmatprep.subr.bf16.mxu0 %v2869_v26 }
 0x1ad   :  { %p2987_p0 = pnand %p2986_p13, %p2980_p10 }
 0x1af   :  { %2067 = vmatpush1.bf16.msra.mxu0 %v2867_v27 }
 0x1b0   :  { %2068 = vmatprep.subr.bf16.mxu0 %v2872_v28 }
 0x1b3   :  { %2069 = vmatpush1.bf16.msra.mxu0 %v2870_v13 }
 0x1b4   :  { %2070 = vmatprep.subr.bf16.mxu0 %v2875_v29 }
 0x1b7   :  { %2071 = vmatpush1.bf16.msra.mxu0 %v2873_v38 }
 0x1b8   :  { %2072 = vmatprep.subr.bf16.mxu0 %v2878_v31 }
 0x1bb   :  { %2073 = vmatpush1.bf16.msra.mxu0 %v2876_v10 }
 0x1bc   :  { %2074 = vmatprep.subr.bf16.mxu0 %v2881_v32 }
 0x1bf   :  { %2075 = vmatpush1.bf16.msra.mxu0 %v2879_v33 }
 0x1c0   :  { %2076 = vmatprep.subr.bf16.mxu0 %v2884_v34 }
 0x1c3   :  { %2077 = vmatpush1.bf16.msra.mxu0 %v2882_v54 }
 0x1c4   :  { %2078 = vmatprep.subr.bf16.mxu0 %v2887_v35 }
 0x1c7   :  { %2079 = vmatpush1.bf16.msra.mxu0 %v2885_v36  ;;  %v2183_v25 = vpop.permute.xlu0 %2182 }
 0x1c8   :  { %2080 = vmatprep.subr.bf16.mxu0 %v2890_v37  ;;  %v2188_v2 = vrot.slane %v2183_v25, %v3131_v3 }
 0x1cb   :  { %2081 = vmatpush1.bf16.msra.mxu0 %v2888_v39 }
 0x1cc   :  { %2082 = vmatprep.subr.bf16.mxu0 %v2893_v40 }
 0x1cf   :  { %2083 = vmatpush1.bf16.msra.mxu0 %v2891_v41 }
 0x1d0   :  { %2084 = vmatprep.subr.bf16.mxu0 %v2896_v42 }
 0x1d3   :  { %2085 = vmatpush1.bf16.msra.mxu0 %v2894_v43 }
 0x1d4   :  { %2086 = vmatprep.subr.bf16.mxu0 %v2899_v44 }
 0x1d7   :  { %2087 = vmatpush1.bf16.msra.mxu0 %v2897_v45 }
 0x1d8   :  { %2088 = vmatprep.subr.bf16.mxu0 %v2902_v46 }
 0x1db   :  { %2089 = vmatpush1.bf16.msra.mxu0 %v2900_v47 }
 0x1dc   :  { %2090 = vmatprep.subr.bf16.mxu0 %v2905_v48 }
 0x1df   :  { %2091 = vmatpush1.bf16.msra.mxu0 %v2903_v49 }
 0x1e0   :  { %2092 = vmatprep.subr.bf16.mxu0 %v2908_v50 }
 0x1e3   :  { %2093 = vmatpush1.bf16.msra.mxu0 %v2906_v51 }
 0x21a   :  { %v1606_v57 = vpop.f32.mrb[4].mxu1 }
 0x21b   :  { %v2481_v58 = vadd.f32 %v1606_v57, %v292_v55  ;;  %v1608_v59 = vpop.f32.mrb[5].mxu1 }
 0x21c   :  { %v2482_v60 = vadd.f32 %v1608_v59, %v296_v56  ;;  %v1610_v61 = vpop.f32.mrb[6].mxu1 }
 0x21d   :  { %v1615_v62 = vmul.f32 0.01, %v2481_v58  ;;  %v1611_v63 = vpop.f32.mrb[7].mxu1 }
 0x21e   :  { %v1616_v0 = vmul.f32 0.01, %v2482_v60 }
 0x21f   :  { %v1619_v1 = vmax.f32 %v2481_v58, %v1615_v62 }
 0x220   :  { %v1620_v30 = vmax.f32 %v2482_v60, %v1616_v0 }
 0x221   :  { %v1623_v5 = vpack.c.bf16 %v1619_v1, %v1619_v1 }
 0x222   :  { %v1624_v4 = vpack.c.bf16 %v1620_v30, %v1620_v30 }
 0x224   :  { %2094 = vmatprep.mubr.bf16.mxu0 %v1624_v4 }
 0x225   :  { %2095 = vmatmul.mubr.bf16.vlgmr.msra.gmra.mrb[4].mxu0 %v1623_v5 }
 0x2f8   :  { %v2096_v11 = vpop.f32.mrb[4].mxu0 }
 0x2f9   :  { %v2483_v12 = vadd.f32 %v2096_v11, %v1694_v8  ;;  %v2098_v14 = vpop.f32.mrb[5].mxu0 }
 0x2fa   :  { %v2484_v15 = vadd.f32 %v2098_v14, %v1698_v9  ;;  %v2100_v16 = vpop.f32.mrb[6].mxu0 }
 0x2fb   :  { %v2103_v17 = vmul.f32 0.01, %v2483_v12  ;;  %v2101_v18 = vpop.f32.mrb[7].mxu0 }
 0x2fc   :  { %v2104_v21 = vmul.f32 0.01, %v2484_v15 }
 0x2fd   :  { %v2105_v23 = vmax.f32 %v2483_v12, %v2103_v17 }
 0x2fe   :  { %v2106_v22 = vmax.f32 %v2484_v15, %v2104_v21 }
 0x300   :  { %2109 = vmatprep.subr.mxu1 %v2106_v22 }
 0x301   :  { %2110 = vmatpush1.xpose.msra.mxu1 %v2105_v23 }
 0x304   :  { %2174 = vmatmul.mubr.f32.vlgmr.msra.gmra.mrb[8].mxu1 %v2107_v24 }
 0x3d7   :  { %v2175_v19 = vpop.f32.mrb[8].mxu1 }
 0x3d8   :  { %v2189_v26 = vadd.f32 %v2188_v2, %v2175_v19  ;;  %v2177_v27 = vpop.f32.mrb[9].mxu1 }
 0x3da   :  { %v2476_v28 = vmul.f32 -1.442695, %v2189_v26 }
 0x3dc   :  { %2909 = vpow2.f32 %v2476_v28 }
 0x3e6   :  { %v2910_v13 = vpop.eup %2909 }
 0x3e7   :  { %v2193_v29 = vadd.f32 1.0, %v2910_v13 }
 0x3e9   :  { %2911 = vrcp.f32 %v2193_v29 }
 0x3f3   :  { %v2912_v38 = vpop.eup %2911 }
 0x3f4   :  { %2197 = vst.msk [vmem:[#allocation9] sm:$0x1] %vm2196_vm1, %v2912_v38 }
 0x3f5   :  { %2990 = shalt.err (!%p2987_p0)
}
 0x3f6   :  { %s2991_s26 = scalar_lea.hbm %s3180_s7, 16 }
 0x3f7   :  { %p2992_p1 = scmp.ne.s32.totalorder %s3180_s7, %s2991_s26  ;;  %p2995_p2 = scmp.lt.u32.totalorder %s2991_s26, %s3180_s7 }
 0x3f9   :  { %p2997_p3 = pnand %p2995_p2, %p2992_p1 }
 0x3fb   :  { %3000 = shalt.err (!%p2997_p3)
}
 0x3fc   :  { %2207 = dma.vmem_to_hbm [thread:$0]  %s2205_s22, 16, %s3180_s7, [#allocation5]  }
 0x3fd   :  { %3005 = dma.done.wait [#allocation5], 16  }
 0x3fe   :  { %3006 = vsyncadd [#allocation5], 4294967280 }
 0x3ff   :  { %2211 = vsyncpa [#allocation4], 1 }
 0x400   :  { %2212 = vsyncpa [#allocation7], 1 }
 0x401   :  { %2213 = vsyncpa [#allocation5], 1 }

</bundles_post_ra>
